<compile_context>
chip_gen: v7x
topology: tpu7x:2x2x1
jax: 0.10.0
libtpu: 0.0.40
codegen_flags: <defaults>
</compile_context>

<pallas_src>
import math

import jax
import jax.numpy as jnp
from jax.experimental import pallas as pl
from jax.experimental.pallas import tpu as pltpu

_LANE = 128
_X_BLOCK_BUDGET = 4 << 20          # ~4 MiB per x tile: >=85% of HBM roofline, v7x-safe


def _round_up(n: int, m: int) -> int:
    return ((n + m - 1) // m) * m


def _sublane_multiple(dtype) -> int:
    # Physical sublane tiling: (8,128) f32, (16,128) bf16, (32,128) int8/fp8.
    return max(8, 32 // jnp.dtype(dtype).itemsize)


def _sinusoidal_table(seq_len: int, dim_emb: int) -> jax.Array:
    """pe[s, d] = sin(s*w_d) for even d, cos(s*w_d) for odd d.  (S, D) f32."""
    pos = jnp.arange(seq_len, dtype=jnp.float32)[:, None]
    dim = jnp.arange(dim_emb, dtype=jnp.int32)[None, :]
    pair = (dim // 2).astype(jnp.float32)
    inv_freq = jnp.exp(pair * (-2.0 * math.log(10000.0) / float(dim_emb)))
    angle = pos * inv_freq
    return jnp.where((dim % 2) == 0, jnp.sin(angle), jnp.cos(angle))


_PE_CACHE: dict = {}


def _get_pe_table(seq_len: int, dim_emb: int, dtype) -> jax.Array:
    """Table built once outside the jit, cached, stored in x.dtype."""
    key = (seq_len, dim_emb, jnp.dtype(dtype).name)
    if key not in _PE_CACHE:
        _PE_CACHE[key] = _sinusoidal_table(seq_len, dim_emb).astype(dtype)
    return _PE_CACHE[key]


def _add_pe_kernel(x_ref, pe_ref, o_ref):
    """o = x + pe.  x/o: (1, TR, TC) tiles; pe: (TR, TC) tile (batch-invariant)."""
    x = x_ref[...].astype(jnp.float32)
    pe = pe_ref[...].astype(jnp.float32)
    o_ref[...] = (x + pe[None, :, :]).astype(o_ref.dtype)


def _plan(B: int, S: int, D: int, dtype):
    """Static tiling plan: layout fold, padding, tile sizes, grid, VMEM limit."""
    itemsize = jnp.dtype(dtype).itemsize
    sub = _sublane_multiple(dtype)

    # Fold the minimal number of sequence steps into the lane axis so the
    # flattened feature width is a multiple of 128 whenever possible.
    S2 = None
    for cand in range(1, S + 1):
        if S % cand == 0 and (cand * D) % _LANE == 0:
            S2 = cand
            break
    if S2 is None:
        S2 = S                      # no exact fold; lane axis gets zero-padded below
    S1 = S // S2
    C0 = S2 * D

    # ---- column (lane) tile --------------------------------------------------
    C = _round_up(C0, _LANE)
    max_tc = (_X_BLOCK_BUDGET // (sub * itemsize)) // _LANE * _LANE
    max_tc = max(_LANE, min(max_tc, 8192))
    if C <= max_tc:
        TC = C
    else:
        t = max_tc
        while t > 512 and C % t != 0:
            t -= _LANE
        if C % t == 0:
            TC = t
        else:
            # No decent divisor: pad the lane axis instead of collapsing to a
            # slow 128-wide tile.
            TC = min(max_tc, 1024)
            C = _round_up(C0, TC)

    # ---- row (sublane) tile --------------------------------------------------
    if S1 <= sub:
        TR, S1p = S1, S1            # tiny case; full-extent row block is allowed
    else:
        S1p = _round_up(S1, sub)
        rows_budget = max(sub, (_X_BLOCK_BUDGET // (TC * itemsize)) // sub * sub)
        TR = min(S1p, rows_budget)
        while TR > sub and S1p % TR != 0:
            TR -= sub
    nR = S1p // TR
    nC = C // TC

    # v7x megacore: make sure the all-"parallel" grid has at least 2 steps.
    if B * nR * nC == 1 and C >= 2 * _LANE:
        if (C // _LANE) % 2:
            C += _LANE
        TC = C // 2
        nC = 2

    # VMEM accounting *with* sublane padding -> compiler limit.
    tr_pad = _round_up(TR, sub)
    blk = tr_pad * TC * itemsize                  # one padded (TR, TC) tile
    vmem_needed = 2 * (3 * blk)                   # double-buffered x-in, pe, out
    vmem_limit = int(min(max(vmem_needed + (4 << 20), 16 << 20), 48 << 20))

    return S1, S2, C0, C, S1p, TR, TC, nR, nC, vmem_limit


@jax.jit
def _position_emb_jit(x: jax.Array, pe: jax.Array) -> jax.Array:
    B, S, D = x.shape
    dtype = x.dtype
    S1, S2, C0, C, S1p, TR, TC, nR, nC, vmem_limit = _plan(B, S, D, dtype)

    x3 = x.reshape(B, S1, C0)
    pe2 = pe.astype(dtype).reshape(S1, C0)

    padded = (C != C0) or (S1p != S1)
    if padded:
        x3 = jnp.pad(x3, ((0, 0), (0, S1p - S1), (0, C - C0)))
        pe2 = jnp.pad(pe2, ((0, S1p - S1), (0, C - C0)))

    out3 = pl.pallas_call(
        _add_pe_kernel,
        out_shape=jax.ShapeDtypeStruct((B, S1p, C), dtype),
        grid_spec=pltpu.PrefetchScalarGridSpec(
            num_scalar_prefetch=0,
            grid=(nR, nC, B),                      # B innermost -> pe DMA elided
            in_specs=[
                pl.BlockSpec((1, TR, TC), lambda i, j, b: (b, i, j)),   # x tile
                pl.BlockSpec((TR, TC), lambda i, j, b: (i, j)),         # pe tile
            ],
            out_specs=pl.BlockSpec((1, TR, TC), lambda i, j, b: (b, i, j)),
        ),
        compiler_params=pltpu.CompilerParams(
            dimension_semantics=("parallel", "parallel", "parallel"),
            vmem_limit_bytes=vmem_limit,
        ),
        input_output_aliases={0: 0},
    )(x3, pe2)

    if padded:
        out3 = out3[:, :S1, :C0]
    return out3.reshape(B, S, D)


def position_emb(x: jax.Array, pe: jax.Array | None = None) -> jax.Array:
    """x: [B, S, D]; returns x + fixed sinusoidal positional embedding."""
    _, S, D = x.shape
    if pe is None:
        pe = _get_pe_table(S, D, x.dtype)
    return _position_emb_jit(x, pe)


def position_emb_reference(x: jax.Array) -> jax.Array:
    """Pure-JAX reference for correctness checking."""
    _, S, D = x.shape
    pe = _sinusoidal_table(S, D)
    return (x.astype(jnp.float32) + pe[None, :, :]).astype(x.dtype)


if __name__ == "__main__":
    key = jax.random.PRNGKey(0)
    B, S, dim_emb = 2, 8, 32
    x = jax.random.normal(key, (B, S, dim_emb), dtype=jnp.float32)

    ref = position_emb_reference(x)

    out = jax.block_until_ready(position_emb(x))

    assert out.shape == (B, S, dim_emb)
    assert jnp.allclose(out, ref, atol=1e-5, rtol=1e-5)

    print("KERNEL_OK")
</pallas_src>

<mosaic_0001>
module attributes {stable_mosaic.version = 11 : i64} {
  func.func @_add_pe_kernel(%arg0: i32, %arg1: i32, %arg2: i32, %arg3: memref<1x2x128xf32, #tpu.memory_space<vmem>>, %arg4: memref<2x128xf32, #tpu.memory_space<vmem>>, %arg5: memref<1x2x128xf32, #tpu.memory_space<vmem>>) attributes {dimension_semantics = [#tpu.dimension_semantics<parallel>, #tpu.dimension_semantics<parallel>, #tpu.dimension_semantics<parallel>], iteration_bounds = array<i64: 1, 1, 2>, scalar_prefetch = 0 : i64, scratch_operands = 0 : i64, tpu.core_type = #tpu.core_type<tc>, window_params = [{transform_indices = @transform_0, window_bounds = array<i64: 1, 2, 128>}, {transform_indices = @transform_1, window_bounds = array<i64: 2, 128>}, {transform_indices = @transform_2, window_bounds = array<i64: 1, 2, 128>}]} {
    %c0 = arith.constant 0 : index
    %c0_0 = arith.constant 0 : index
    %c0_1 = arith.constant 0 : index
    %0 = vector.load %arg3[%c0, %c0_0, %c0_1] : memref<1x2x128xf32, #tpu.memory_space<vmem>>, vector<1x2x128xf32>
    %c0_2 = arith.constant 0 : index
    %c0_3 = arith.constant 0 : index
    %1 = vector.load %arg4[%c0_2, %c0_3] : memref<2x128xf32, #tpu.memory_space<vmem>>, vector<2x128xf32>
    %2 = vector.shape_cast %1 : vector<2x128xf32> to vector<1x2x128xf32>
    %3 = arith.addf %0, %2 : vector<1x2x128xf32>
    %c0_4 = arith.constant 0 : index
    %c0_5 = arith.constant 0 : index
    %c0_6 = arith.constant 0 : index
    %4 = vector.load %arg5[%c0_4, %c0_5, %c0_6] : memref<1x2x128xf32, #tpu.memory_space<vmem>>, vector<1x2x128xf32>
    tpu.vector_store %arg5[%c0_4, %c0_5, %c0_6], %3 {strides = array<i32>} : memref<1x2x128xf32, #tpu.memory_space<vmem>>, vector<1x2x128xf32>,
    return
  }
  func.func @transform_0(%arg0: i32, %arg1: i32, %arg2: i32) -> (i32, i32, i32) {
    %c0_i32 = arith.constant 0 : i32
    return %arg2, %arg0, %arg1 : i32, i32, i32
  }
  func.func @transform_1(%arg0: i32, %arg1: i32, %arg2: i32) -> (i32, i32) {
    %c0_i32 = arith.constant 0 : i32
    return %arg0, %arg1 : i32, i32
  }
  func.func @transform_2(%arg0: i32, %arg1: i32, %arg2: i32) -> (i32, i32, i32) {
    %c0_i32 = arith.constant 0 : i32
    return %arg2, %arg0, %arg1 : i32, i32, i32
  }
}

</mosaic_0001>

<bundles_post_ra>
// kernel: _position_emb_jit.1
= control target key start
LH: loop header
LB: loop body
LE: loop exit
PB: predicated region body
PF: predicated region fallthrough
CT: control target
= control target key end

     0   :  { %s410_s9 = smov 0   ;;  %s387_s10 = smov 0   ;;  %s424_s0 = inlined_call_operand.vmem [shape: f32[2,2,128], index: 0, kind: input, shape index: {}, may-alias: {0,2}]   ;;  %s425_s1 = inlined_call_operand.vmem [shape: f32[2,128], index: 1, kind: input, shape index: {}]   ;;  %s426_s2 = inlined_call_operand.vmem [shape: f32[2,2,128], index: 2, kind: output, shape index: {}, may-alias: {0,2}]  }
   0x1   :  { %s391_s11 = smov 0  }
   0x2 LB: > { %s24_s12 = sadd.s32 1, %s389_s10  ;;  %p342_p0 = scmp.ge.s32.totalorder %s393_s11, 1  ;;  %s393_s11 = sphi %s391_s11, %s12_s11   ;;  %s389_s10 = sphi %s387_s10, %s388_s10   ;;  %s385_s9 = sphi %s410_s9, %s427_s9  }
   0x3   : > { %p25_p1 = scmp.ge.s32.totalorder %s24_s12, 2  ;;  %p158_p2 = scmp.lt.s32.totalorder %s393_s11, 3 }
   0x5   : > { %s429_s12 = smov (%p25_p1, %s24_s12), 0  ;;  %p159_p3 = pnand %p342_p0, %p158_p2 }
   0x6   : > { %p197_p4 = scmp.lt.s32.totalorder (!%p159_p3), %s385_s9, 1  ;;  %v225_v0 = vld [vmem:[%s425_s1] sm:$0x3] (!%p159_p3) }
   0x7   : > { %162 = sbr.rel (%p159_p3) target bundleno = 21 (0x15), region = 28 }
   0xe   : > { %s431_s9 = smov (!%p197_p4, %s385_s9), 1 }
   0xf   : > { %s343_s13 = sshll.u32 %s431_s9, 1 }
  0x10   : > { %s206_s18 = scalar_lea.vmem %s424_s0, %s343_s13  ;;  %s223_s21 = scalar_lea.vmem %s426_s2, %s343_s13 }
  0x11   : > { %v224_v1 = vld [vmem:[%s206_s18] sm:$0x3] }
  0x12   : > { %v226_v2 = vadd.f32 %v225_v0, %v224_v1 }
  0x14   : > { %227 = vst [vmem:[%s223_s21] sm:$0x3] %v226_v2 }
  0x15 PF: > { %s12_s11 = sadd.s32 1, %s393_s11   ;;  %s427_s9 = smov %s389_s10 }
  0x16   : > { %p9_p5 = scmp.ge.s32.totalorder %s12_s11, 4   ;;  %s388_s10 = smov %s429_s12  }
  0x18   :  { %11 = sbr.rel (!%p9_p5) target bundleno = 2 (0x2), region = 61 }

</bundles_post_ra>
